<compile_context>
chip_gen: v6e
topology: v6e:2x2x1
jax: 0.10.0
libtpu: 0.0.40
codegen_flags: <defaults>
</compile_context>

<pallas_src>
import functools

import jax
import jax.numpy as jnp
from jax.experimental import pallas as pl
from jax.experimental.pallas import tpu as pltpu


def _round_up(x, m):
    return ((x + m - 1) // m) * m


def _cdiv(a, b):
    return (a + b - 1) // b


# ---------------------------------------------------------------------------
# Kernel body: one batch tile; all weights resident in VMEM.
# ---------------------------------------------------------------------------
def merge_layer_kernel(x1_ref, x2_ref, w1a_ref, w1b_ref, b1_ref,
                       w2_ref, b2_ref, o_ref):
    cdt = w1a_ref.dtype                    # matmul operand dtype (bf16 or f32)
    x1 = x1_ref[...].astype(cdt)
    x2 = x2_ref[...].astype(cdt)
    # fc1 on the virtually-concatenated input: x1 @ W1a + x2 @ W1b + b1
    h = jnp.dot(x1, w1a_ref[...], preferred_element_type=jnp.float32)
    h = h + jnp.dot(x2, w1b_ref[...], preferred_element_type=jnp.float32)
    h = jnp.maximum(h + b1_ref[...], 0.0)  # bias + ReLU in f32
    # fc2
    y = jnp.dot(h.astype(w2_ref.dtype), w2_ref[...],
                preferred_element_type=jnp.float32)
    o_ref[...] = (y + b2_ref[...]).astype(o_ref.dtype)


# ---------------------------------------------------------------------------
# One-time parameter preparation (split / pad dim3 / cast). Do NOT redo per call.
# ---------------------------------------------------------------------------
def prepare_merge_layer_params(w1, b1, w2, b2, dim1, *,
                               compute_dtype=jnp.bfloat16):
    """Split W1, zero-pad dim3 to a multiple of 128 (lane-dense hidden), cast
    matmul operands to `compute_dtype`; biases stay f32 (post-accumulation).
    dim4 is kept at its natural width (no output padding / wrapper slice)."""
    din, dim3 = w1.shape
    dim2 = din - dim1
    assert dim2 > 0 and w2.shape[0] == dim3
    dim4 = w2.shape[1]
    dim3p = _round_up(dim3, 128)
    w1a = jnp.pad(w1[:dim1, :], ((0, 0), (0, dim3p - dim3))).astype(compute_dtype)
    w1b = jnp.pad(w1[dim1:, :], ((0, 0), (0, dim3p - dim3))).astype(compute_dtype)
    w2p = jnp.pad(w2, ((0, dim3p - dim3), (0, 0))).astype(compute_dtype)
    b1p = jnp.pad(b1.astype(jnp.float32), (0, dim3p - dim3)).reshape(1, dim3p)
    b2p = b2.astype(jnp.float32).reshape(1, dim4)
    return dict(w1a=w1a, w1b=w1b, b1=b1p, w2=w2p, b2=b2p,
                dim1=dim1, dim2=dim2, dim3p=dim3p, dim4=dim4)


# ---------------------------------------------------------------------------
# Generation-aware sizing.
# ---------------------------------------------------------------------------
@functools.lru_cache(maxsize=1)
def _chip_info():
    """(vmem_bytes_per_tensorcore, tensorcores_per_chip). Defaults to v5e/v6e
    numbers (128 MiB, 1 TC) when the query is unavailable."""
    vmem = 128 << 20
    try:
        info = pltpu.get_tpu_info()
        vmem = int(getattr(info, "vmem_capacity_bytes", vmem)) or (128 << 20)
    except Exception:
        pass
    # Chips with <=64 MiB VMEM per TensorCore (v7x) ship two TCs per chip.
    cores = 2 if vmem <= (64 << 20) else 1
    return vmem, cores


def _pick_tm(batch, dim1, dim2, dim3p, dim4, in_elt, w_elt, out_elt,
             vmem_per_core, cores_per_chip):
    """Largest batch tile that fits the per-core VMEM budget (cap 2048 rows);
    on multi-TC chips keep >=2 grid steps of >=256 rows when the batch allows."""
    bp = _round_up(max(batch, 1), 8)
    budget = int(vmem_per_core * 0.75)                       # Mosaic headroom
    w_bytes = (2 * ((dim1 + dim2) * dim3p + dim3p * dim4) * w_elt
               + 2 * (dim3p + dim4) * 4)                     # resident weights
    per_row = (2 * (dim1 + dim2) * in_elt                    # 2-buf x tiles
               + 2 * dim4 * out_elt                          # 2-buf out tile
               + 2 * dim3p * 4)                              # f32 intermediates
    avail = max(budget - w_bytes - (4 << 20), 1 << 20)
    tm_max = max(8, (avail // per_row) // 8 * 8)
    tm = max(8, min(2048, bp, tm_max))
    if (cores_per_chip > 1 and bp >= cores_per_chip * 256
            and _cdiv(bp, tm) < cores_per_chip):
        # v7x: split so both TensorCores get >=256-row tiles.
        tm = min(tm, max(256, _round_up(_cdiv(bp, cores_per_chip), 8)))
    return tm


def _vmem_limit_bytes(tm, dim1, dim2, dim3p, dim4, in_elt, w_elt, out_elt,
                      vmem_per_core):
    xbuf = 2 * tm * (dim1 + dim2) * in_elt                   # 2-buf x tiles
    obuf = 2 * tm * dim4 * out_elt                           # 2-buf out tiles
    wbuf = 2 * ((dim1 + dim2) * dim3p + dim3p * dim4) * w_elt
    bbuf = 2 * (dim3p + dim4) * 4
    hbuf = 2 * tm * dim3p * 4                                # f32 intermediates
    need = int(1.3 * (xbuf + obuf + wbuf + bbuf + hbuf)) + (4 << 20)
    cap = int(vmem_per_core * 0.80)   # ~51 MiB on v7x, ~102 MiB on v5e/v6e
    return int(max(16 << 20, min(need, cap)))


# ---------------------------------------------------------------------------
# Wrapper.
# ---------------------------------------------------------------------------
def merge_layer_apply(x1, x2, params, *, tm=None, out_dtype=None,
                      single_buffer_weights=None):
    """x1: (B, dim1), x2: (B, dim2); params from prepare_merge_layer_params.
    Inputs may be f32 or bf16; out_dtype defaults to x1.dtype."""
    B, dim1 = x1.shape
    B2, dim2 = x2.shape
    assert B == B2 and dim1 == params["dim1"] and dim2 == params["dim2"]
    dim3p, dim4 = params["dim3p"], params["dim4"]
    if out_dtype is None:
        out_dtype = x1.dtype

    in_elt = jnp.dtype(x1.dtype).itemsize
    w_elt = jnp.dtype(params["w1a"].dtype).itemsize
    out_elt = jnp.dtype(out_dtype).itemsize
    vmem_per_core, cores_per_chip = _chip_info()

    if tm is None:
        tm = _pick_tm(B, dim1, dim2, dim3p, dim4, in_elt, w_elt, out_elt,
                      vmem_per_core, cores_per_chip)
    tm = max(8, _round_up(int(tm), 8))
    tm = min(tm, _round_up(B, 8))
    grid = (_cdiv(B, tm),)            # partial tail block handled by Pallas

    vmem_limit = _vmem_limit_bytes(tm, dim1, dim2, dim3p, dim4,
                                   in_elt, w_elt, out_elt, vmem_per_core)

    # Single-buffer constant-index weight blocks only when they are big enough
    # for the double-buffer copy to matter (avoids fragile fallback paths).
    w_bytes = ((dim1 + dim2) * dim3p + dim3p * dim4) * w_elt
    if single_buffer_weights is None:
        single_buffer_weights = w_bytes > (8 << 20)
    wkw = {"pipeline_mode": pl.Buffered(1)} if single_buffer_weights else {}

    flops = 2 * B * ((dim1 + dim2) * dim3p + dim3p * dim4)
    bytes_accessed = (B * (dim1 + dim2) * in_elt + B * dim4 * out_elt
                      + w_bytes + (dim3p + dim4) * 4)
    cost = pl.CostEstimate(flops=flops, transcendentals=0,
                           bytes_accessed=bytes_accessed)

    in_specs = [
        pl.BlockSpec((tm, dim1), lambda i: (i, 0)),               # x1 tile
        pl.BlockSpec((tm, dim2), lambda i: (i, 0)),               # x2 tile
        pl.BlockSpec((dim1, dim3p), lambda i: (0, 0), **wkw),     # W1a
        pl.BlockSpec((dim2, dim3p), lambda i: (0, 0), **wkw),     # W1b
        pl.BlockSpec((1, dim3p), lambda i: (0, 0), **wkw),        # b1
        pl.BlockSpec((dim3p, dim4), lambda i: (0, 0), **wkw),     # W2
        pl.BlockSpec((1, dim4), lambda i: (0, 0), **wkw),         # b2
    ]

    out = pl.pallas_call(
        merge_layer_kernel,
        out_shape=jax.ShapeDtypeStruct((B, dim4), out_dtype),
        grid_spec=pltpu.PrefetchScalarGridSpec(
            num_scalar_prefetch=0,
            grid=grid,
            in_specs=in_specs,
            out_specs=pl.BlockSpec((tm, dim4), lambda i: (i, 0)),
        ),
        compiler_params=pltpu.CompilerParams(
            dimension_semantics=("parallel",),
            vmem_limit_bytes=vmem_limit),
        cost_estimate=cost,
    )(x1, x2, params["w1a"], params["w1b"], params["b1"],
      params["w2"], params["b2"])
    return out


def merge_layer(x1, x2, w1, b1, w2, b2, *, compute_dtype=jnp.bfloat16, tm=None):
    """Convenience wrapper: prefer prepare_merge_layer_params once + apply."""
    params = prepare_merge_layer_params(w1, b1, w2, b2, x1.shape[1],
                                        compute_dtype=compute_dtype)
    return merge_layer_apply(x1, x2, params, tm=tm)


# ---------------------------------------------------------------------------
# Init (mirrors the module: xavier_normal_ weights, PyTorch-default biases)
# and pure-JAX reference.
# ---------------------------------------------------------------------------
def init_params(key, dim1, dim2, dim3, dim4, dtype=jnp.float32):
    k1, k2, k3, k4 = jax.random.split(key, 4)
    fan_in1, fan_out1 = dim1 + dim2, dim3
    fan_in2, fan_out2 = dim3, dim4
    std1 = (2.0 / (fan_in1 + fan_out1)) ** 0.5
    std2 = (2.0 / (fan_in2 + fan_out2)) ** 0.5
    # Stored already transposed to (in_features, out_features) for x @ W.
    w1 = std1 * jax.random.normal(k1, (fan_in1, fan_out1), dtype)
    w2 = std2 * jax.random.normal(k2, (fan_in2, fan_out2), dtype)
    bound1 = 1.0 / (fan_in1 ** 0.5)
    bound2 = 1.0 / (fan_in2 ** 0.5)
    b1 = jax.random.uniform(k3, (fan_out1,), dtype, -bound1, bound1)
    b2 = jax.random.uniform(k4, (fan_out2,), dtype, -bound2, bound2)
    return w1, b1, w2, b2


def reference(x1, x2, w1, b1, w2, b2):
    x = jnp.concatenate([x1, x2], axis=-1)
    h = jnp.maximum(x @ w1 + b1, 0.0)
    return h @ w2 + b2


if __name__ == "__main__":
    key = jax.random.PRNGKey(0)
    kx1, kx2, kp = jax.random.split(key, 3)

    # Small TGAT-like shapes.
    B, dim1, dim2, dim3, dim4 = 24, 32, 32, 64, 16
    x1 = jax.random.normal(kx1, (B, dim1), jnp.float32)
    x2 = jax.random.normal(kx2, (B, dim2), jnp.float32)
    w1, b1, w2, b2 = init_params(kp, dim1, dim2, dim3, dim4)
    ref = reference(x1, x2, w1, b1, w2, b2)

    # 1) f32 compute path: tight check against the reference.
    p_f32 = prepare_merge_layer_params(w1, b1, w2, b2, dim1,
                                       compute_dtype=jnp.float32)
    out_f32 = jax.block_until_ready(merge_layer_apply(x1, x2, p_f32))
    assert out_f32.shape == (B, dim4)
    assert jnp.allclose(out_f32, ref, atol=1e-5, rtol=1e-5)

    # 2) bf16 MXU path (default), f32 I/O: f32 accumulation, relaxed tolerance.
    p_bf16 = prepare_merge_layer_params(w1, b1, w2, b2, dim1)
    out_bf16 = jax.block_until_ready(merge_layer_apply(x1, x2, p_bf16))
    assert out_bf16.shape == (B, dim4)
    assert jnp.allclose(out_bf16, ref, atol=7.5e-2, rtol=7.5e-2)

    # 3) bf16 end-to-end I/O on a ragged batch (multi-step grid + partial
    #    tail block, no wrapper padding / slicing).
    Br = 200
    x1r = jax.random.normal(jax.random.PRNGKey(1), (Br, dim1), jnp.float32)
    x2r = jax.random.normal(jax.random.PRNGKey(2), (Br, dim2), jnp.float32)
    x1b = x1r.astype(jnp.bfloat16)
    x2b = x2r.astype(jnp.bfloat16)
    ref_r = reference(x1b.astype(jnp.float32), x2b.astype(jnp.float32),
                      w1, b1, w2, b2)
    out_r = jax.block_until_ready(merge_layer_apply(x1b, x2b, p_bf16, tm=64))
    assert out_r.shape == (Br, dim4) and out_r.dtype == jnp.bfloat16
    assert jnp.allclose(out_r.astype(jnp.float32), ref_r,
                        atol=1.5e-1, rtol=1.5e-1)

    print("KERNEL_OK")
</pallas_src>

<mosaic_0001>
module attributes {stable_mosaic.version = 11 : i64} {
  func.func @merge_layer_kernel(%arg0: i32, %arg1: memref<24x32xf32, #tpu.memory_space<vmem>>, %arg2: memref<24x32xf32, #tpu.memory_space<vmem>>, %arg3: memref<32x128xf32, #tpu.memory_space<vmem>>, %arg4: memref<32x128xf32, #tpu.memory_space<vmem>>, %arg5: memref<1x128xf32, #tpu.memory_space<vmem>>, %arg6: memref<128x16xf32, #tpu.memory_space<vmem>>, %arg7: memref<1x16xf32, #tpu.memory_space<vmem>>, %arg8: memref<24x16xf32, #tpu.memory_space<vmem>>) attributes {dimension_semantics = [#tpu.dimension_semantics<parallel>], iteration_bounds = array<i64: 1>, scalar_prefetch = 0 : i64, scratch_operands = 0 : i64, tpu.core_type = #tpu.core_type<tc>, window_params = [{transform_indices = @transform_0, window_bounds = array<i64: 24, 32>}, {transform_indices = @transform_1, window_bounds = array<i64: 24, 32>}, {pipeline_mode = #tpu.pipeline_mode<synchronous>, transform_indices = @transform_2, window_bounds = array<i64: 32, 128>}, {pipeline_mode = #tpu.pipeline_mode<synchronous>, transform_indices = @transform_3, window_bounds = array<i64: 32, 128>}, {pipeline_mode = #tpu.pipeline_mode<synchronous>, transform_indices = @transform_4, window_bounds = array<i64: 1, 128>}, {pipeline_mode = #tpu.pipeline_mode<synchronous>, transform_indices = @transform_5, window_bounds = array<i64: 128, 16>}, {pipeline_mode = #tpu.pipeline_mode<synchronous>, transform_indices = @transform_6, window_bounds = array<i64: 1, 16>}, {transform_indices = @transform_7, window_bounds = array<i64: 24, 16>}]} {
    %c0 = arith.constant 0 : index
    %c0_0 = arith.constant 0 : index
    %0 = vector.load %arg1[%c0, %c0_0] : memref<24x32xf32, #tpu.memory_space<vmem>>, vector<24x32xf32>
    %c0_1 = arith.constant 0 : index
    %c0_2 = arith.constant 0 : index
    %1 = vector.load %arg2[%c0_1, %c0_2] : memref<24x32xf32, #tpu.memory_space<vmem>>, vector<24x32xf32>
    %c0_3 = arith.constant 0 : index
    %c0_4 = arith.constant 0 : index
    %2 = vector.load %arg3[%c0_3, %c0_4] : memref<32x128xf32, #tpu.memory_space<vmem>>, vector<32x128xf32>
    %cst = arith.constant dense<0.000000e+00> : vector<24x128xf32>
    %3 = tpu.matmul %0, %2, %cst {dimension_numbers = #tpu.dot_dimension_numbers<[1], [0], [0], [1], [0, 0, 1, 1], [], []>} : vector<24x32xf32>, vector<32x128xf32>, vector<24x128xf32> -> vector<24x128xf32>
    %c0_5 = arith.constant 0 : index
    %c0_6 = arith.constant 0 : index
    %4 = vector.load %arg4[%c0_5, %c0_6] : memref<32x128xf32, #tpu.memory_space<vmem>>, vector<32x128xf32>
    %cst_7 = arith.constant dense<0.000000e+00> : vector<24x128xf32>
    %5 = tpu.matmul %1, %4, %cst_7 {dimension_numbers = #tpu.dot_dimension_numbers<[1], [0], [0], [1], [0, 0, 1, 1], [], []>} : vector<24x32xf32>, vector<32x128xf32>, vector<24x128xf32> -> vector<24x128xf32>
    %6 = arith.addf %3, %5 : vector<24x128xf32>
    %c0_8 = arith.constant 0 : index
    %c0_9 = arith.constant 0 : index
    %7 = vector.load %arg5[%c0_8, %c0_9] : memref<1x128xf32, #tpu.memory_space<vmem>>, vector<1x128xf32>
    %8 = vector.broadcast %7 : vector<1x128xf32> to vector<24x128xf32>
    %9 = arith.addf %6, %8 : vector<24x128xf32>
    %cst_10 = arith.constant 0.000000e+00 : f32
    %10 = vector.broadcast %cst_10 : f32 to vector<24x128xf32>
    %11 = arith.maximumf %9, %10 : vector<24x128xf32>
    %c0_11 = arith.constant 0 : index
    %c0_12 = arith.constant 0 : index
    %12 = vector.load %arg6[%c0_11, %c0_12] : memref<128x16xf32, #tpu.memory_space<vmem>>, vector<128x16xf32>
    %cst_13 = arith.constant dense<0.000000e+00> : vector<24x16xf32>
    %13 = tpu.matmul %11, %12, %cst_13 {dimension_numbers = #tpu.dot_dimension_numbers<[1], [0], [0], [1], [0, 0, 1, 1], [], []>} : vector<24x128xf32>, vector<128x16xf32>, vector<24x16xf32> -> vector<24x16xf32>
    %c0_14 = arith.constant 0 : index
    %c0_15 = arith.constant 0 : index
    %14 = vector.load %arg7[%c0_14, %c0_15] : memref<1x16xf32, #tpu.memory_space<vmem>>, vector<1x16xf32>
    %15 = vector.broadcast %14 : vector<1x16xf32> to vector<24x16xf32>
    %16 = arith.addf %13, %15 : vector<24x16xf32>
    %c0_16 = arith.constant 0 : index
    %c0_17 = arith.constant 0 : index
    %17 = vector.load %arg8[%c0_16, %c0_17] : memref<24x16xf32, #tpu.memory_space<vmem>>, vector<24x16xf32>
    tpu.vector_store %arg8[%c0_16, %c0_17], %16 {strides = array<i32>} : memref<24x16xf32, #tpu.memory_space<vmem>>, vector<24x16xf32>,
    return
  }
  func.func @transform_0(%arg0: i32) -> (i32, i32) {
    %c0_i32 = arith.constant 0 : i32
    %c0_i32_0 = arith.constant 0 : i32
    return %arg0, %c0_i32 : i32, i32
  }
  func.func @transform_1(%arg0: i32) -> (i32, i32) {
    %c0_i32 = arith.constant 0 : i32
    %c0_i32_0 = arith.constant 0 : i32
    return %arg0, %c0_i32 : i32, i32
  }
  func.func @transform_2(%arg0: i32) -> (i32, i32) {
    %c0_i32 = arith.constant 0 : i32
    %c0_i32_0 = arith.constant 0 : i32
    %c0_i32_1 = arith.constant 0 : i32
    return %c0_i32, %c0_i32_0 : i32, i32
  }
  func.func @transform_3(%arg0: i32) -> (i32, i32) {
    %c0_i32 = arith.constant 0 : i32
    %c0_i32_0 = arith.constant 0 : i32
    %c0_i32_1 = arith.constant 0 : i32
    return %c0_i32, %c0_i32_0 : i32, i32
  }
  func.func @transform_4(%arg0: i32) -> (i32, i32) {
    %c0_i32 = arith.constant 0 : i32
    %c0_i32_0 = arith.constant 0 : i32
    %c0_i32_1 = arith.constant 0 : i32
    return %c0_i32, %c0_i32_0 : i32, i32
  }
  func.func @transform_5(%arg0: i32) -> (i32, i32) {
    %c0_i32 = arith.constant 0 : i32
    %c0_i32_0 = arith.constant 0 : i32
    %c0_i32_1 = arith.constant 0 : i32
    return %c0_i32, %c0_i32_0 : i32, i32
  }
  func.func @transform_6(%arg0: i32) -> (i32, i32) {
    %c0_i32 = arith.constant 0 : i32
    %c0_i32_0 = arith.constant 0 : i32
    %c0_i32_1 = arith.constant 0 : i32
    return %c0_i32, %c0_i32_0 : i32, i32
  }
  func.func @transform_7(%arg0: i32) -> (i32, i32) {
    %c0_i32 = arith.constant 0 : i32
    %c0_i32_0 = arith.constant 0 : i32
    return %arg0, %c0_i32 : i32, i32
  }
}

</mosaic_0001>

<bundles_post_ra>
// kernel: tpu_custom_call.1
= control target key start
LH: loop header
LB: loop body
LE: loop exit
PB: predicated region body
PF: predicated region fallthrough
CT: control target
= control target key end

     0   :  { %v461_v0 = vmov 0.0   ;;  %vm462_vm0 = vmmov 0   ;;  %vm40_vm1 = vcmask 261120   ;;  %vm335_vm2 = vcmask 130048   ;;  %s656_s3 = inlined_call_operand.vmem [shape: f32[32,128], index: 3, kind: input, shape index: {}]   ;;  %s657_s5 = inlined_call_operand.vmem [shape: f32[128,16], index: 5, kind: input, shape index: {}]   ;;  %s658_s1 = inlined_call_operand.vmem [shape: f32[24,32], index: 1, kind: input, shape index: {}]   ;;  %s659_s2 = inlined_call_operand.vmem [shape: f32[32,128], index: 2, kind: input, shape index: {}]   ;;  %s660_s0 = inlined_call_operand.vmem [shape: f32[24,32], index: 0, kind: input, shape index: {}]   ;;  %s661_s4 = inlined_call_operand.vmem [shape: f32[1,128], index: 4, kind: input, shape index: {}]   ;;  %s662_s6 = inlined_call_operand.vmem [shape: f32[1,16], index: 6, kind: input, shape index: {}]   ;;  %s663_s7 = inlined_call_operand.vmem [shape: f32[24,16], index: 7, kind: output, shape index: {}]  }
   0x1   :  { %384 = vmatprep.subr.mxu1 %v461_v0  ;;  %v39_v1 = vld [vmem:[%s656_s3 + $0x18] sm:$0xff]  ;;  %v38_v2 = vld [vmem:[%s656_s3 + $0x10] sm:$0xff]  ;;  %392 = vmatprep.mubr.msk.f32.mxu1 %vm462_vm0, %v461_v0  ;;  %v37_v3 = vld [vmem:[%s656_s3 + $0x8] sm:$0xff] }
   0x2   :  { %385 = vmatpush3.msra.mxu1 %v39_v1  ;;  %418 = vmatprep.subr.mxu0 %v461_v0  ;;  %v36_v4 = vld [vmem:[%s656_s3] sm:$0xff]  ;;  %v247_v5 = vld [vmem:[%s657_s5 + $0x78] sm:$0xff]  ;;  %v246_v7 = vld [vmem:[%s657_s5 + $0x70] sm:$0xff] }
   0x3   :  { %386 = vmatprep.subr.mxu1 %v461_v0  ;;  %450 = vmatprep.mubr.msk.f32.mxu0 %vm462_vm0, %v461_v0  ;;  %v29_v6 = vld [vmem:[%s658_s1] sm:$0xff]  ;;  %v35_v8 = vld [vmem:[%s659_s2 + $0x18] sm:$0xff]  ;;  %v34_v9 = vld [vmem:[%s659_s2 + $0x10] sm:$0xff] }
   0x4   :  { %387 = vmatpush3.msra.mxu1 %v38_v2  ;;  %419 = vmatpush3.msra.mxu0 %v247_v5  ;;  %v245_v10 = vld [vmem:[%s657_s5 + $0x68] sm:$0xff]  ;;  %v32_v13 = vld [vmem:[%s659_s2] sm:$0xff]  ;;  %v31_v15 = vld [vmem:[%s658_s1 + $0x10] sm:$0xff] }
   0x5   :  { %388 = vmatprep.subr.mxu1 %v461_v0  ;;  %420 = vmatprep.subr.mxu0 %v461_v0  ;;  %v30_v11 = vld [vmem:[%s658_s1 + $0x8] sm:$0xff]  ;;  %v244_v14 = vld [vmem:[%s657_s5 + $0x60] sm:$0xff]  ;;  %v243_v16 = vld [vmem:[%s657_s5 + $0x58] sm:$0xff] }
   0x6   :  { %389 = vmatpush3.msra.mxu1 %v37_v3  ;;  %421 = vmatpush3.msra.mxu0 %v246_v7  ;;  %v33_v12 = vld [vmem:[%s659_s2 + $0x8] sm:$0xff]  ;;  %v242_v17 = vld [vmem:[%s657_s5 + $0x50] sm:$0xff]  ;;  %v26_v18 = vld [vmem:[%s660_s0] sm:$0xff] }
   0x7   :  { %390 = vmatprep.subr.mxu1 %v461_v0  ;;  %422 = vmatprep.subr.mxu0 %v461_v0  ;;  %v27_v19 = vld [vmem:[%s660_s0 + $0x8] sm:$0xff]  ;;  %v28_v20 = vld [vmem:[%s660_s0 + $0x10] sm:$0xff]  ;;  %v240_v22 = vld [vmem:[%s657_s5 + $0x40] sm:$0xff] }
   0x8   :  { %391 = vmatpush3.msra.mxu1 %v36_v4  ;;  %423 = vmatpush3.msra.mxu0 %v245_v10  ;;  %v241_v21 = vld [vmem:[%s657_s5 + $0x48] sm:$0xff]  ;;  %v239_v23 = vld [vmem:[%s657_s5 + $0x38] sm:$0xff]  ;;  %v238_v24 = vld [vmem:[%s657_s5 + $0x30] sm:$0xff] }
   0x9   :  { %393 = vmatmul.mubr.msk.f32.vlgmr.msra.gmra.mxu1 %vm40_vm1, %v29_v6  ;;  %401 = vmatprep.subr.mxu1 %v461_v0  ;;  %v237_v25 = vld [vmem:[%s657_s5 + $0x28] sm:$0xff]  ;;  %v236_v26 = vld [vmem:[%s657_s5 + $0x20] sm:$0xff]  ;;  %v235_v27 = vld [vmem:[%s657_s5 + $0x18] sm:$0xff] }
   0xa   :  { %402 = vmatpush3.msra.mxu1 %v35_v8  ;;  %395 = vmatprep.mubr.msk.f32.mxu1 %vm462_vm0, %v461_v0  ;;  %v234_v28 = vld [vmem:[%s657_s5 + $0x10] sm:$0xff]  ;;  %v233_v29 = vld [vmem:[%s657_s5 + $0x8] sm:$0xff]  ;;  %v232_v30 = vld [vmem:[%s657_s5] sm:$0xff] }
   0xb   :  { %403 = vmatprep.subr.mxu1 %v461_v0  ;;  %424 = vmatprep.subr.mxu0 %v461_v0  ;;  %v349_v38 = vld [vmem:[%s661_s4] ss:$0 sm:$0xff] }
   0xc   :  { %404 = vmatpush3.msra.mxu1 %v34_v9  ;;  %425 = vmatpush3.msra.mxu0 %v244_v14  ;;  %v350_v53 = vld [vmem:[%s662_s6] ss:$0 sm:$0xff] }
   0xd   :  { %396 = vmatmul.mubr.msk.f32.gmra.mxu1 %vm40_vm1, %v30_v11  ;;  %405 = vmatprep.subr.mxu1 %v461_v0 }
   0xe   :  { %398 = vmatprep.mubr.msk.f32.mxu1 %vm462_vm0, %v461_v0  ;;  %406 = vmatpush3.msra.mxu1 %v33_v12 }
   0xf   :  { %407 = vmatprep.subr.mxu1 %v461_v0  ;;  %426 = vmatprep.subr.mxu0 %v461_v0 }
  0x10   :  { %408 = vmatpush3.msra.mxu1 %v32_v13  ;;  %427 = vmatpush3.msra.mxu0 %v243_v16 }
  0x11   :  { %399 = vmatmul.mubr.msk.f32.gmra.mxu1 %vm40_vm1, %v31_v15  ;;  %428 = vmatprep.subr.mxu0 %v461_v0 }
  0x12   :  { %409 = vmatprep.mubr.msk.f32.mxu1 %vm462_vm0, %v461_v0  ;;  %429 = vmatpush3.msra.mxu0 %v242_v17 }
  0x13   :  { %430 = vmatprep.subr.mxu0 %v461_v0 }
  0x14   :  { %431 = vmatpush3.msra.mxu0 %v241_v21 }
  0x15   :  { %410 = vmatmul.mubr.msk.f32.vlgmr.msra.gmra.mxu1 %vm40_vm1, %v26_v18  ;;  %432 = vmatprep.subr.mxu0 %v461_v0 }
  0x16   :  { %412 = vmatprep.mubr.msk.f32.mxu1 %vm462_vm0, %v461_v0  ;;  %433 = vmatpush3.msra.mxu0 %v240_v22 }
  0x17   :  { %434 = vmatprep.subr.mxu0 %v461_v0 }
  0x18   :  { %435 = vmatpush3.msra.mxu0 %v239_v23 }
  0x19   :  { %413 = vmatmul.mubr.msk.f32.gmra.mxu1 %vm40_vm1, %v27_v19  ;;  %436 = vmatprep.subr.mxu0 %v461_v0 }
  0x1a   :  { %415 = vmatprep.mubr.msk.f32.mxu1 %vm462_vm0, %v461_v0  ;;  %437 = vmatpush3.msra.mxu0 %v238_v24 }
  0x1b   :  { %438 = vmatprep.subr.mxu0 %v461_v0 }
  0x1c   :  { %439 = vmatpush3.msra.mxu0 %v237_v25 }
  0x1d   :  { %416 = vmatmul.mubr.msk.f32.gmra.mxu1 %vm40_vm1, %v28_v20  ;;  %440 = vmatprep.subr.mxu0 %v461_v0 }
  0x1e   :  { %441 = vmatpush3.msra.mxu0 %v236_v26 }
  0x1f   :  { %442 = vmatprep.subr.mxu0 %v461_v0 }
  0x20   :  { %443 = vmatpush3.msra.mxu0 %v235_v27 }
  0x21   :  { %444 = vmatprep.subr.mxu0 %v461_v0 }
  0x22   :  { %445 = vmatpush3.msra.mxu0 %v234_v28 }
  0x23   :  { %446 = vmatprep.subr.mxu0 %v461_v0 }
  0x24   :  { %447 = vmatpush3.msra.mxu0 %v233_v29 }
  0x25   :  { %448 = vmatprep.subr.mxu0 %v461_v0 }
  0x26   :  { %449 = vmatpush3.msra.mxu0 %v232_v30 }
  0xc9   :  { %v116_v31 = vpop.f32.mrf.mxu1 }
  0xcb   :  { %v394_v32 = vpop.f32.mrf.mxu1 }
  0xcd   :  { %v121_v33 = vpop.f32.mrf.mxu1 }
  0xcf   :  { %v397_v34 = vpop.f32.mrf.mxu1 }
  0xd1   :  { %v126_v35 = vpop.f32.mrf.mxu1 }
  0xd3   :  { %v400_v36 = vpop.f32.mrf.mxu1 }
  0xd5   :  { %v205_v37 = vpop.f32.mrf.mxu1 }
  0xd6   :  { %v206_v39 = vadd.f32 %v205_v37, %v116_v31 }
  0xd7   :  { %v411_v40 = vpop.f32.mrf.mxu1 }
  0xd8   :  { %v226_v41 = vadd.f32 %v349_v38, %v206_v39 }
  0xd9   :  { %v210_v42 = vpop.f32.mrf.mxu1 }
  0xda   :  { %v229_v43 = vmax.f32 %v226_v41, 0.0  ;;  %v211_v44 = vadd.f32 %v210_v42, %v121_v33 }
  0xdb   :  { %v414_v45 = vpop.f32.mrf.mxu1 }
  0xdc   :  { %v227_v46 = vadd.f32 %v349_v38, %v211_v44  ;;  %451 = vmatmul.mubr.f32.vlgmr.msra.gmra.mxu0 %v229_v43 }
  0xdd   :  { %v215_v47 = vpop.f32.mrf.mxu1  ;;  %453 = vmatprep.mubr.msk.f32.mxu0 %vm462_vm0, %v461_v0 }
  0xde   :  { %v230_v48 = vmax.f32 %v227_v46, 0.0  ;;  %v216_v49 = vadd.f32 %v215_v47, %v126_v35 }
  0xdf   :  { %v417_v50 = vpop.f32.mrf.mxu1 }
  0xe0   :  { %v228_v51 = vadd.f32 %v349_v38, %v216_v49  ;;  %454 = vmatmul.mubr.f32.gmra.mxu0 %v230_v48 }
  0xe1   :  { %456 = vmatprep.mubr.msk.f32.mxu0 %vm462_vm0, %v461_v0 }
  0xe2   :  { %v231_v52 = vmax.f32 %v228_v51, 0.0 }
  0xe4   :  { %457 = vmatmul.mubr.f32.gmra.mxu0 %v231_v52 }
 0x19c   :  { %v321_v54 = vpop.f32.mrf.mxu0 }
 0x19d   :  { %v322_v55 = vadd.f32 %v350_v53, %v321_v54 }
 0x19e   :  { %v452_v56 = vpop.f32.mrf.mxu0 }
 0x19f   :  { %336 = vst.msk [vmem:[%s663_s7] sm:$0xff] %vm335_vm2, %v322_v55 }
 0x1a0   :  { %v326_v57 = vpop.f32.mrf.mxu0 }
 0x1a1   :  { %v327_v58 = vadd.f32 %v350_v53, %v326_v57 }
 0x1a2   :  { %v455_v59 = vpop.f32.mrf.mxu0 }
 0x1a3   :  { %337 = vst.msk [vmem:[%s663_s7 + $0x8] sm:$0xff] %vm335_vm2, %v327_v58 }
 0x1a4   :  { %v331_v60 = vpop.f32.mrf.mxu0 }
 0x1a5   :  { %v332_v61 = vadd.f32 %v350_v53, %v331_v60 }
 0x1a6   :  { %v458_v62 = vpop.f32.mrf.mxu0 }
 0x1a7   :  { %338 = vst.msk [vmem:[%s663_s7 + $0x10] sm:$0xff] %vm335_vm2, %v332_v61 }

</bundles_post_ra>
